<compile_context>
chip_gen: v5e
topology: v5e:2x2
jax: 0.10.0
libtpu: 0.0.40
codegen_flags: <defaults>
</compile_context>

<pallas_src>
import numpy as np
import jax
import jax.numpy as jnp
from jax.experimental import pallas as pl
from jax.experimental.pallas import tpu as pltpu

_EPS = 1e-5      # nn.BatchNorm2d default eps
_LANE = 128


def _round_up(v, m):
    return ((v + m - 1) // m) * m


def _pad_last(a, to):
    d = to - a.shape[-1]
    if d == 0:
        return a
    return jnp.pad(a, [(0, 0)] * (a.ndim - 1) + [(0, d)])


# --------------------------------------------------------------------------
# hardware-aware sizing
# --------------------------------------------------------------------------
def _vmem_cap():
    phys = 64 << 20
    try:
        phys = int(getattr(pltpu.get_tpu_info(), "vmem_capacity_bytes", phys))
    except Exception:
        pass
    if phys <= (64 << 20):                 # v7x: 64 MiB/TC -> leave Mosaic headroom
        return 52 << 20
    return min(phys - (24 << 20), 104 << 20)   # v5e/v6e: 128 MiB physical


def _pick_band(H, W, Cp, cdt):
    """Largest even row-band dividing H whose working set fits the per-pass budget."""
    item = np.dtype(cdt).itemsize
    budget = _vmem_cap() // 4
    best = 2
    for band in range(2, H + 1, 2):
        if H % band:
            continue
        approx = band * W * Cp * (4 * item + 12)   # dbl-buffered blocks + f32 temps
        if approx <= budget:
            best = band
    return best


def _compiler_params(block_defs, temp_f32_elems):
    """Parallel (N, band) grid + VMEM limit including in-kernel temporaries."""
    blocks = sum(int(np.prod(s)) * np.dtype(d).itemsize for s, d in block_defs)
    need = 2 * blocks + 4 * int(temp_f32_elems) + (4 << 20)
    limit = int(min(max(need, 32 << 20), _vmem_cap()))
    return pltpu.CompilerParams(
        dimension_semantics=("parallel", "parallel"),
        vmem_limit_bytes=limit)


# --------------------------------------------------------------------------
# pass 1: conv1 (hoisted im2col) + bias, per-band BN1 partial statistics
# --------------------------------------------------------------------------
def _conv1_kernel(xc_ref, w_ref, b_ref, y_ref, st_ref):
    _, BAND, W, K = xc_ref.shape
    Cp = y_ref.shape[-1]
    lhs = xc_ref[0].reshape(BAND * W, K)
    y = jnp.dot(lhs, w_ref[...], preferred_element_type=jnp.float32) + b_ref[...]
    y_ref[0] = y.reshape(BAND, W, Cp).astype(y_ref.dtype)
    st = jnp.concatenate([jnp.sum(y, axis=0, keepdims=True),
                          jnp.sum(y * y, axis=0, keepdims=True)], axis=0)
    st_ref[...] = st.reshape(1, 1, 2, Cp)


# --------------------------------------------------------------------------
# pass 2: BN1 + ReLU + conv2 + bias, per-band BN2 partial statistics
# --------------------------------------------------------------------------
def _bn_relu_conv2_kernel(body_ref, top_ref, bot_ref, s_ref, t_ref,
                          w_ref, b_ref, y2_ref, st_ref, ap_ref):
    _, BAND, W, Cp = body_ref.shape
    b_idx = pl.program_id(1)
    nb = pl.num_programs(1)
    s = s_ref[...]
    t = t_ref[...]
    act = lambda v: jnp.maximum(v.astype(jnp.float32) * s + t, 0.0)

    # Assemble the halo'd activation in a persistent VMEM scratch:
    # interior = BN+ReLU of the band rows, top/bottom row = neighbour band row
    # (zeroed at image borders -> conv zero-padding), side columns = zeros.
    a_body = act(body_ref[0])                                   # (BAND, W, Cp)
    a_top = jnp.where(b_idx == 0, 0.0, act(top_ref[0]))         # (1, W, Cp)
    a_bot = jnp.where(b_idx == nb - 1, 0.0, act(bot_ref[0]))    # (1, W, Cp)
    zcol = jnp.zeros((BAND + 2, 1, Cp), ap_ref.dtype)
    ap_ref[:, 0:1, :] = zcol
    ap_ref[:, W + 1:W + 2, :] = zcol
    ap_ref[0:1, 1:W + 1, :] = a_top.astype(ap_ref.dtype)
    ap_ref[1:BAND + 1, 1:W + 1, :] = a_body.astype(ap_ref.dtype)
    ap_ref[BAND + 1:BAND + 2, 1:W + 1, :] = a_bot.astype(ap_ref.dtype)

    # 3x3 conv as 9 accumulated K=Cp matmuls (no (HW, 9C) im2col LHS).
    # TODO(synk): dx=1,2 taps are sublane-offset slices; build them with
    # pltpu.roll if profiling shows relayout cost.
    ap = ap_ref[...]
    y = b_ref[...]                                              # (1, Cp) f32
    for k in range(9):
        dy, dx = divmod(k, 3)
        tap = ap[dy:dy + BAND, dx:dx + W, :].reshape(BAND * W, Cp)
        y = y + jnp.dot(tap, w_ref[k], preferred_element_type=jnp.float32)
    y2_ref[0] = y.reshape(BAND, W, Cp).astype(y2_ref.dtype)
    st = jnp.concatenate([jnp.sum(y, axis=0, keepdims=True),
                          jnp.sum(y * y, axis=0, keepdims=True)], axis=0)
    st_ref[...] = st.reshape(1, 1, 2, Cp)


# --------------------------------------------------------------------------
# pass 3: BN2 + ReLU + maxpool2 + 1x1 stride-2 shortcut + add + ReLU
# --------------------------------------------------------------------------
def _bn_relu_pool_shortcut_kernel(y2_ref, s_ref, t_ref, xs_ref, wsc_ref,
                                  bsc_ref, o_ref):
    _, BAND, W, Cp = y2_ref.shape
    _, BO, WO, Cin = xs_ref.shape
    a = jnp.maximum(y2_ref[0].astype(jnp.float32) * s_ref[...] + t_ref[...], 0.0)
    r = jnp.max(a.reshape(BO, 2, W, Cp), axis=1)         # row-pair max (free reshape)
    pooled = jnp.max(r.reshape(BO, WO, 2, Cp), axis=2)   # column-pair max
    sc = jnp.dot(xs_ref[0].reshape(BO * WO, Cin), wsc_ref[...],
                 preferred_element_type=jnp.float32) + bsc_ref[...]
    o_ref[0] = jnp.maximum(sc.reshape(BO, WO, Cp) + pooled, 0.0).astype(o_ref.dtype)


# --------------------------------------------------------------------------
# BN finalize (wrapper side)
# --------------------------------------------------------------------------
def _finish_bn(st, gamma, beta, count, Cp):
    """st: (N, nbands, 2, Cp) per-band [sum; sum_sq]. Returns (scale, shift) rows."""
    # TODO(synk): E[x^2]-E[x]^2 in f32 can lose precision for very large N*H*W;
    # switch to a shifted / two-pass variance if that matters.
    s = jnp.sum(st[:, :, 0, :], axis=(0, 1))
    sq = jnp.sum(st[:, :, 1, :], axis=(0, 1))
    mean = s / count
    var = jnp.maximum(sq / count - mean * mean, 0.0)       # biased var (train mode)
    g = _pad_last(gamma.astype(jnp.float32).reshape(1, -1), Cp)
    be = _pad_last(beta.astype(jnp.float32).reshape(1, -1), Cp)
    scale = g * jax.lax.rsqrt(var + _EPS)
    shift = be - mean * scale
    return scale, shift


# --------------------------------------------------------------------------
# wrapper
# --------------------------------------------------------------------------
def res_unet_block_down(x_nchw, params, compute_dtype=jnp.bfloat16, band_rows=None):
    N, Cin, H, W = x_nchw.shape
    # TODO(synk): the F.pad(diffX, diffY) alignment path only matters for odd
    # H/W (pool vs stride-2 shortcut size mismatch); even sizes assumed here.
    assert H % 2 == 0 and W % 2 == 0, "even spatial sizes assumed (diffX/diffY == 0)"
    Cout = params["w1"].shape[0]
    cdt = compute_dtype
    Cp = _round_up(Cout, _LANE)          # lane-dense stores / full MXU width
    K1 = 9 * Cin
    K1p = _round_up(K1, _LANE)
    Ho, Wo = H // 2, W // 2
    count = float(N * H * W)

    BAND = band_rows if band_rows is not None else _pick_band(H, W, Cp, cdt)
    assert H % BAND == 0 and BAND % 2 == 0, "band must be even and divide H"
    NB = H // BAND
    BO = BAND // 2

    x = jnp.transpose(x_nchw, (0, 2, 3, 1)).astype(jnp.float32)          # NHWC
    # conv1's im2col hoisted to XLA (Cin is small); lane-padded K so pass 1 is
    # a single lane-dense matmul per band with zero in-kernel layout work.
    # TODO(synk): for deeper blocks (large Cin) compute conv1 in-kernel like
    # conv2 instead of streaming the 9x im2col from HBM.
    xp = jnp.pad(x, ((0, 0), (1, 1), (1, 1), (0, 0)))
    cols = [xp[:, dy:dy + H, dx:dx + W, :] for dy in range(3) for dx in range(3)]
    x_cols = _pad_last(jnp.concatenate(cols, axis=-1), K1p).astype(cdt)  # (N,H,W,K1p)
    x_s = x[:, ::2, ::2, :].astype(cdt)                                  # shortcut taps

    # OIHW -> (ky,kx,ci,co); zero-pad channels so padded lanes stay exactly 0.
    w1 = jnp.transpose(params["w1"], (2, 3, 1, 0)).reshape(K1, Cout)
    w1 = jnp.pad(w1, ((0, K1p - K1), (0, Cp - Cout))).astype(cdt)
    w2 = jnp.transpose(params["w2"], (2, 3, 1, 0)).reshape(9, Cout, Cout)
    w2 = jnp.pad(w2, ((0, 0), (0, Cp - Cout), (0, Cp - Cout))).astype(cdt)
    wsc = jnp.transpose(params["wsc"][:, :, 0, 0], (1, 0))
    wsc = jnp.pad(wsc, ((0, 0), (0, Cp - Cout))).astype(cdt)
    rowp = lambda v: _pad_last(v.reshape(1, -1), Cp).astype(jnp.float32)
    b1, b2, bsc = rowp(params["b1"]), rowp(params["b2"]), rowp(params["bsc"])

    band = lambda sh: pl.BlockSpec(sh, lambda n, b: (n, b, 0, 0))
    const2 = lambda sh: pl.BlockSpec(sh, lambda n, b: (0, 0))
    const3 = lambda sh: pl.BlockSpec(sh, lambda n, b: (0, 0, 0))
    stat_spec = pl.BlockSpec((1, 1, 2, Cp), lambda n, b: (n, b, 0, 0))
    # TODO(synk): if profiling shows exposed DMA on the y1/y2 streams, add
    # pipeline_mode=pl.Buffered(3) to the band specs of passes 2/3.

    # ------------------ pass 1: conv1 (+ BN1 partial stats) ------------------
    y1, st1 = pl.pallas_call(
        _conv1_kernel,
        grid=(N, NB),
        in_specs=[band((1, BAND, W, K1p)), const2((K1p, Cp)), const2((1, Cp))],
        out_specs=[band((1, BAND, W, Cp)), stat_spec],
        out_shape=[jax.ShapeDtypeStruct((N, H, W, Cp), cdt),
                   jax.ShapeDtypeStruct((N, NB, 2, Cp), jnp.float32)],
        compiler_params=_compiler_params(
            [((1, BAND, W, K1p), cdt), ((K1p, Cp), cdt), ((1, Cp), jnp.float32),
             ((1, BAND, W, Cp), cdt), ((1, 1, 2, Cp), jnp.float32)],
            3 * BAND * W * Cp),
    )(x_cols, w1, b1)

    scale1, shift1 = _finish_bn(st1, params["g1"], params["be1"], count, Cp)

    # ------------ pass 2: BN1+ReLU+conv2 (+ BN2 partial stats) ---------------
    top_spec = pl.BlockSpec((1, 1, W, Cp),
                            lambda n, b: (n, jnp.maximum(b * BAND - 1, 0), 0, 0))
    bot_spec = pl.BlockSpec((1, 1, W, Cp),
                            lambda n, b: (n, jnp.minimum((b + 1) * BAND, H - 1), 0, 0))
    y2, st2 = pl.pallas_call(
        _bn_relu_conv2_kernel,
        grid=(N, NB),
        in_specs=[band((1, BAND, W, Cp)), top_spec, bot_spec,
                  const2((1, Cp)), const2((1, Cp)),
                  const3((9, Cp, Cp)), const2((1, Cp))],
        out_specs=[band((1, BAND, W, Cp)), stat_spec],
        out_shape=[jax.ShapeDtypeStruct((N, H, W, Cp), cdt),
                   jax.ShapeDtypeStruct((N, NB, 2, Cp), jnp.float32)],
        scratch_shapes=[pltpu.VMEM((BAND + 2, W + 2, Cp), cdt)],
        compiler_params=_compiler_params(
            [((1, BAND, W, Cp), cdt), ((1, 1, W, Cp), cdt), ((1, 1, W, Cp), cdt),
             ((1, Cp), jnp.float32), ((1, Cp), jnp.float32),
             ((9, Cp, Cp), cdt), ((1, Cp), jnp.float32),
             ((1, BAND, W, Cp), cdt), ((1, 1, 2, Cp), jnp.float32),
             ((BAND + 2, W + 2, Cp), cdt)],
            5 * BAND * W * Cp),
    )(y1, y1, y1, scale1, shift1, w2, b2)

    scale2, shift2 = _finish_bn(st2, params["g2"], params["be2"], count, Cp)

    # -------- pass 3: BN2+ReLU+maxpool2 + 1x1/s2 shortcut + add + ReLU -------
    out = pl.pallas_call(
        _bn_relu_pool_shortcut_kernel,
        grid=(N, NB),
        in_specs=[band((1, BAND, W, Cp)),
                  const2((1, Cp)), const2((1, Cp)),
                  band((1, BO, Wo, Cin)),
                  const2((Cin, Cp)), const2((1, Cp))],
        out_specs=band((1, BO, Wo, Cp)),
        out_shape=jax.ShapeDtypeStruct((N, Ho, Wo, Cp), cdt),
        compiler_params=_compiler_params(
            [((1, BAND, W, Cp), cdt), ((1, Cp), jnp.float32), ((1, Cp), jnp.float32),
             ((1, BO, Wo, Cin), cdt), ((Cin, Cp), cdt), ((1, Cp), jnp.float32),
             ((1, BO, Wo, Cp), cdt)],
            3 * BAND * W * Cp),
    )(y2, scale2, shift2, x_s, wsc, bsc)

    # TODO(synk): BatchNorm running_mean/var buffers are not updated/produced
    # (training-mode forward output only).
    out = out[:, :, :, :Cout]                      # drop lane padding
    return jnp.transpose(out, (0, 3, 1, 2))        # back to NCHW (compute dtype)


# --------------------------------------------------------------------------
# pure-JAX reference (train-mode BN), for validation
# --------------------------------------------------------------------------
def _ref_forward(x, p):
    def conv(v, w, b, stride=1, pad=1):
        y = jax.lax.conv_general_dilated(
            v, w, window_strides=(stride, stride),
            padding=[(pad, pad), (pad, pad)],
            dimension_numbers=("NCHW", "OIHW", "NCHW"))
        return y + b.reshape(1, -1, 1, 1)

    def bn_train(y, g, b):
        mean = y.mean(axis=(0, 2, 3), keepdims=True)
        var = ((y - mean) ** 2).mean(axis=(0, 2, 3), keepdims=True)
        return (y - mean) * jax.lax.rsqrt(var + _EPS) * g.reshape(1, -1, 1, 1) \
            + b.reshape(1, -1, 1, 1)

    relu = lambda v: jnp.maximum(v, 0.0)
    sc = conv(x, p["wsc"], p["bsc"], stride=2, pad=0)
    out = relu(bn_train(conv(x, p["w1"], p["b1"]), p["g1"], p["be1"]))
    out = relu(bn_train(conv(out, p["w2"], p["b2"]), p["g2"], p["be2"]))
    N, C, H, W = out.shape
    out = out.reshape(N, C, H // 2, 2, W // 2, 2).max(axis=(3, 5))
    return relu(sc + out)


if __name__ == "__main__":
    N, Cin, Cout, H, W = 2, 4, 8, 16, 16
    ks = jax.random.split(jax.random.PRNGKey(0), 11)
    params = {
        "w1": 0.2 * jax.random.normal(ks[0], (Cout, Cin, 3, 3), jnp.float32),
        "b1": 0.1 * jax.random.normal(ks[1], (Cout,), jnp.float32),
        "g1": 1.0 + 0.1 * jax.random.normal(ks[2], (Cout,), jnp.float32),
        "be1": 0.1 * jax.random.normal(ks[3], (Cout,), jnp.float32),
        "w2": 0.2 * jax.random.normal(ks[4], (Cout, Cout, 3, 3), jnp.float32),
        "b2": 0.1 * jax.random.normal(ks[5], (Cout,), jnp.float32),
        "g2": 1.0 + 0.1 * jax.random.normal(ks[6], (Cout,), jnp.float32),
        "be2": 0.1 * jax.random.normal(ks[7], (Cout,), jnp.float32),
        "wsc": 0.3 * jax.random.normal(ks[8], (Cout, Cin, 1, 1), jnp.float32),
        "bsc": 0.1 * jax.random.normal(ks[9], (Cout,), jnp.float32),
    }
    x = jax.random.normal(ks[10], (N, Cin, H, W), jnp.float32)

    ref = jax.block_until_ready(_ref_forward(x, params))

    # f32 compute, auto band (whole image): tight check against f32 reference.
    out32 = jax.block_until_ready(
        res_unet_block_down(x, params, compute_dtype=jnp.float32))
    assert out32.shape == (N, Cout, H // 2, W // 2), out32.shape
    if not jnp.allclose(out32, ref, atol=1e-4, rtol=1e-4):
        raise AssertionError(
            f"f32 mismatch: max abs err {float(jnp.max(jnp.abs(out32 - ref)))}")

    # f32 compute, forced 4-row bands: exercises the multi-band halo path.
    out32b = jax.block_until_ready(
        res_unet_block_down(x, params, compute_dtype=jnp.float32, band_rows=4))
    if not jnp.allclose(out32b, ref, atol=1e-4, rtol=1e-4):
        raise AssertionError(
            f"banded f32 mismatch: max abs err "
            f"{float(jnp.max(jnp.abs(out32b - ref)))}")

    # default bf16-matmul path: loose check (bf16 rounding through two convs+BN).
    out16 = jax.block_until_ready(res_unet_block_down(x, params))
    assert out16.shape == (N, Cout, H // 2, W // 2), out16.shape
    if not jnp.allclose(out16.astype(jnp.float32), ref, atol=1e-1, rtol=1e-1):
        raise AssertionError(
            f"bf16 mismatch: max abs err "
            f"{float(jnp.max(jnp.abs(out16.astype(jnp.float32) - ref)))}")

    print("KERNEL_OK")
</pallas_src>

<mosaic_0001>
module attributes {stable_mosaic.version = 11 : i64} {
  func.func @_conv1_kernel(%arg0: i32, %arg1: i32, %arg2: memref<1x16x16x128xf32, #tpu.memory_space<vmem>>, %arg3: memref<128x128xf32, #tpu.memory_space<vmem>>, %arg4: memref<1x128xf32, #tpu.memory_space<vmem>>, %arg5: memref<1x16x16x128xf32, #tpu.memory_space<vmem>>, %arg6: memref<1x1x2x128xf32, #tpu.memory_space<vmem>>) attributes {dimension_semantics = [#tpu.dimension_semantics<parallel>, #tpu.dimension_semantics<parallel>], iteration_bounds = array<i64: 2, 1>, scalar_prefetch = 0 : i64, scratch_operands = 0 : i64, tpu.core_type = #tpu.core_type<tc>, window_params = [{transform_indices = @transform_0, window_bounds = array<i64: 1, 16, 16, 128>}, {pipeline_mode = #tpu.pipeline_mode<synchronous>, transform_indices = @transform_1, window_bounds = array<i64: 128, 128>}, {pipeline_mode = #tpu.pipeline_mode<synchronous>, transform_indices = @transform_2, window_bounds = array<i64: 1, 128>}, {transform_indices = @transform_3, window_bounds = array<i64: 1, 16, 16, 128>}, {transform_indices = @transform_4, window_bounds = array<i64: 1, 1, 2, 128>}]} {
    %c0 = arith.constant 0 : index
    %c0_0 = arith.constant 0 : index
    %c0_1 = arith.constant 0 : index
    %c0_2 = arith.constant 0 : index
    %0 = vector.load %arg2[%c0, %c0_0, %c0_1, %c0_2] : memref<1x16x16x128xf32, #tpu.memory_space<vmem>>, vector<1x16x16x128xf32>
    %1 = vector.shape_cast %0 : vector<1x16x16x128xf32> to vector<16x16x128xf32>
    %2 = vector.shape_cast %1 : vector<16x16x128xf32> to vector<256x128xf32>
    %c0_3 = arith.constant 0 : index
    %c0_4 = arith.constant 0 : index
    %3 = vector.load %arg3[%c0_3, %c0_4] : memref<128x128xf32, #tpu.memory_space<vmem>>, vector<128x128xf32>
    %cst = arith.constant dense<0.000000e+00> : vector<256x128xf32>
    %4 = tpu.matmul %2, %3, %cst {dimension_numbers = #tpu.dot_dimension_numbers<[1], [0], [0], [1], [0, 0, 1, 1], [], []>} : vector<256x128xf32>, vector<128x128xf32>, vector<256x128xf32> -> vector<256x128xf32>
    %c0_5 = arith.constant 0 : index
    %c0_6 = arith.constant 0 : index
    %5 = vector.load %arg4[%c0_5, %c0_6] : memref<1x128xf32, #tpu.memory_space<vmem>>, vector<1x128xf32>
    %6 = vector.broadcast %5 : vector<1x128xf32> to vector<256x128xf32>
    %7 = arith.addf %4, %6 : vector<256x128xf32>
    %8 = vector.shape_cast %7 : vector<256x128xf32> to vector<16x16x128xf32>
    %c0_7 = arith.constant 0 : index
    %c0_8 = arith.constant 0 : index
    %c0_9 = arith.constant 0 : index
    %c0_10 = arith.constant 0 : index
    %9 = vector.load %arg5[%c0_7, %c0_8, %c0_9, %c0_10] : memref<1x16x16x128xf32, #tpu.memory_space<vmem>>, vector<1x16x16x128xf32>
    %10 = vector.shape_cast %9 : vector<1x16x16x128xf32> to vector<16x16x128xf32>
    %11 = vector.shape_cast %8 : vector<16x16x128xf32> to vector<1x16x16x128xf32>
    tpu.vector_store %arg5[%c0_7, %c0_8, %c0_9, %c0_10], %11 {strides = array<i32>} : memref<1x16x16x128xf32, #tpu.memory_space<vmem>>, vector<1x16x16x128xf32>,
    %cst_11 = arith.constant dense<0.000000e+00> : vector<128xf32>
    %12 = vector.multi_reduction <add>, %7, %cst_11 [0] : vector<256x128xf32> to vector<128xf32>
    %13 = vector.shape_cast %12 : vector<128xf32> to vector<1x128xf32>
    %14 = arith.mulf %7, %7 : vector<256x128xf32>
    %cst_12 = arith.constant dense<0.000000e+00> : vector<128xf32>
    %15 = vector.multi_reduction <add>, %14, %cst_12 [0] : vector<256x128xf32> to vector<128xf32>
    %16 = vector.shape_cast %15 : vector<128xf32> to vector<1x128xf32>
    %17 = tpu.concatenate %13, %16 in 0 : vector<1x128xf32>, vector<1x128xf32> -> vector<2x128xf32>
    %18 = vector.shape_cast %17 : vector<2x128xf32> to vector<1x1x2x128xf32>
    %c0_13 = arith.constant 0 : index
    %c0_14 = arith.constant 0 : index
    %c0_15 = arith.constant 0 : index
    %c0_16 = arith.constant 0 : index
    %19 = vector.load %arg6[%c0_13, %c0_14, %c0_15, %c0_16] : memref<1x1x2x128xf32, #tpu.memory_space<vmem>>, vector<1x1x2x128xf32>
    tpu.vector_store %arg6[%c0_13, %c0_14, %c0_15, %c0_16], %18 {strides = array<i32>} : memref<1x1x2x128xf32, #tpu.memory_space<vmem>>, vector<1x1x2x128xf32>,
    return
  }
  func.func @transform_0(%arg0: i32, %arg1: i32) -> (i32, i32, i32, i32) {
    %c0_i32 = arith.constant 0 : i32
    %c0_i32_0 = arith.constant 0 : i32
    %c0_i32_1 = arith.constant 0 : i32
    return %arg0, %arg1, %c0_i32, %c0_i32_0 : i32, i32, i32, i32
  }
  func.func @transform_1(%arg0: i32, %arg1: i32) -> (i32, i32) {
    %c0_i32 = arith.constant 0 : i32
    %c0_i32_0 = arith.constant 0 : i32
    %c0_i32_1 = arith.constant 0 : i32
    return %c0_i32, %c0_i32_0 : i32, i32
  }
  func.func @transform_2(%arg0: i32, %arg1: i32) -> (i32, i32) {
    %c0_i32 = arith.constant 0 : i32
    %c0_i32_0 = arith.constant 0 : i32
    %c0_i32_1 = arith.constant 0 : i32
    return %c0_i32, %c0_i32_0 : i32, i32
  }
  func.func @transform_3(%arg0: i32, %arg1: i32) -> (i32, i32, i32, i32) {
    %c0_i32 = arith.constant 0 : i32
    %c0_i32_0 = arith.constant 0 : i32
    %c0_i32_1 = arith.constant 0 : i32
    return %arg0, %arg1, %c0_i32, %c0_i32_0 : i32, i32, i32, i32
  }
  func.func @transform_4(%arg0: i32, %arg1: i32) -> (i32, i32, i32, i32) {
    %c0_i32 = arith.constant 0 : i32
    %c0_i32_0 = arith.constant 0 : i32
    %c0_i32_1 = arith.constant 0 : i32
    return %arg0, %arg1, %c0_i32, %c0_i32_0 : i32, i32, i32, i32
  }
}

</mosaic_0001>

<bundles_post_ra>
// kernel: tpu_custom_call.1
= control target key start
LH: loop header
LB: loop body
LE: loop exit
PB: predicated region body
PF: predicated region fallthrough
CT: control target
= control target key end

     0   :  { %s1533_s0 = inlined_call_operand.hbm [shape: f32[2,16,16,128], index: 0, kind: input, shape index: {}]   ;;  %s1534_s1 = inlined_call_operand.hbm [shape: f32[128,128], index: 1, kind: input, shape index: {}]   ;;  %s1535_s2 = inlined_call_operand.vmem [shape: f32[1,128], index: 2, kind: input, shape index: {}]   ;;  %s1536_s3 = inlined_call_operand.hbm [shape: f32[2,16,16,128], index: 3, kind: output, shape index: {0}]   ;;  %s1537_s4 = inlined_call_operand.hbm [shape: f32[2,1,2,128], index: 4, kind: output, shape index: {1}]  }
   0x1   :  { %1541 = sst [smem:[#allocation15_spill]] %s1534_s1 }
   0x2   :  { %10 = vsyncpa [#allocation3], 0 }
   0x3   :  { %12 = vsyncpa [#allocation3 + $0x1], 0 }
   0x4   :  { %13 = vsyncpa [#allocation6], 0 }
   0x5   :  { %14 = vsyncpa [#allocation4], 0 }
   0x6   :  { %16 = vsyncpa [#allocation4 + $0x1], 0 }
   0x7   :  { %17 = vsyncpa [#allocation9], 0 }
   0x8   :  { %19 = vsyncpa [#allocation9 + $0x1], 0  ;;  %s1108_s15 = smov 0   ;;  %s1110_s16 = smov 0  }
   0x9   :  { %s1112_s17 = smov 0   ;;  %s1114_s18 = smov 0  }
   0xa   :  { %s1116_s19 = smov 0   ;;  %s1118_s20 = smov 0  }
   0xb LB: > { %s745_s21 = sadd.s32 4294967295, %s1076_s20   ;;  %s746_s22 = sadd.s32 4294967294, %s1076_s20   ;;  %s1076_s20 = sphi %s1118_s20, %s25_s20   ;;  %s1072_s19 = sphi %s1116_s19, %s1558_s19   ;;  %s1068_s18 = sphi %s1114_s18, %s1557_s18   ;;  %s1064_s17 = sphi %s1112_s17, %s1556_s17   ;;  %s1060_s16 = sphi %s1110_s16, %s1555_s16   ;;  %s1056_s15 = sphi %s1108_s15, %s1554_s15  }
   0xc   : > { %p59_p0 = scmp.ne.s32.totalorder %s1060_s16, %s1056_s15  ;;  %p1142_p1 = scmp.eq.s32.totalorder %s745_s21, 0 }
   0xd   : > { %p1146_p2 = scmp.eq.s32.totalorder %s745_s21, 1  ;;  %p133_p3 = scmp.eq.s32.totalorder %s746_s22, 1 }
   0xe   : > { %p1152_p4 = por %p1142_p1, %p59_p0  ;;  %p747_p5 = scmp.ge.s32.totalorder %s1076_s20, 1 }
   0xf   : > { %p1157_p6 = por %p133_p3, %p59_p0  ;;  %p168_p7 = scmp.lt.s32.totalorder %s1076_s20, 3 }
  0x10   : > { %s1546_s1 = sld [smem:[#allocation15_spill]]  ;;  %s1078_s5 = smov [#allocation5]  }
  0x11   : > { %p1165_p8 = pnand %p747_p5, %p168_p7  ;;  %s181_s6 = sshll.u32 %s1078_s5, 4  ;;  %s182_s6 = int_to_ptr.vmem [resolvable:$true] %s181_s6 }
  0x12   : > { %p749_p11 = scmp.ge.s32.totalorder %s1076_s20, 2  ;;  %s1538_s7 = smov 128  }
  0x13   : > { %p825_p9 = pneg %p1165_p8  ;;  %s1539_s8 = smov 8  }
  0x14   : > { %s37_s9 = sadd.s32 1, %s1072_s19  ;;  %s46_s10 = sadd.s32 1, %s1064_s17 }
  0x15   : > { %p826_p10 = pnand %p825_p9, %p1142_p1  ;;  %p39_p12 = scmp.ge.s32.totalorder %s37_s9, 2 }
  0x16   : > { %s179_s29 = sshll.u32 %s1546_s1, 4  ;;  %p53_p13 = scmp.ne.s32.totalorder %s1064_s17, %s1060_s16  ;;  %s180_s29 = int_to_ptr.hbm [resolvable:$true] %s179_s29 }
  0x17   : > { %828 = dma.hbm_to_vmem [thread:$0]  (!%p826_p10), %s180_s29, 2048, %s182_s6, [#allocation6], %s1538_s7, %s1538_s7, %s1539_s8  }
  0x18   : > { %p54_p0 = scmp.eq.s32.totalorder %s1076_s20, 0  ;;  %s1560_s9 = smov (%p39_p12, %s37_s9), 0 }
  0x19   : > { %1548 = sst [smem:[#allocation14_spill]] %s1560_s9  ;;  %p1190_p5 = por %p1146_p2, %p53_p13 }
  0x1a   : > { %p1184_p3 = por %p54_p0, %p53_p13  ;;  %s41_s13 = ssub.s32 %s1072_s19, %s1560_s9 }
  0x1b   : > { %p841_p7 = scmp.lt.s32.totalorder %s1076_s20, 2  ;;  %p44_p9 = scmp.eq.s32.totalorder %s41_s13, 0 }
  0x1c   : > { %s198_s14 = sand.u32 1, %s1064_s17   ;;  %s765_s27 = sshll.u32 %s1072_s19, 8 }
  0x1d   : > { %s750_s21 = sshll.u32 %s198_s14, 8  ;;  %s210_s5 = scalar_lea.hbm %s1533_s0, %s765_s27 }
  0x1e   : > { %s1199_s22 = scalar_select %p44_p9, %s1064_s17, %s46_s10  }
  0x1f   : > { %s202_s6 = scalar_lea.vmem [#allocation2], %s750_s21  ;;  %s211_s24 = sshll.u32 %s210_s5, 4  ;;  %s212_s24 = int_to_ptr.hbm [resolvable:$true] %s211_s24 }
  0x20   : > { %s213_s7 = sshll.u32 %s202_s6, 4  ;;  %p830_p2 = pnand %p841_p7, %p1184_p3  ;;  %s214_s7 = int_to_ptr.vmem [resolvable:$true] %s213_s7 }
  0x21   : > { %s199_s8 = scalar_lea.sflag [#allocation3], %s198_s14  ;;  %s1551_s1 = smov 8  }
  0x22   : > { %s1552_s9 = smov 128   ;;  %225 = sbr.rel (%p1165_p8) target bundleno = 326 (0x146), region = 32 }
  0x23   : > { %832 = dma.hbm_to_vmem [thread:$0]  (!%p830_p2), %s212_s24, 4096, %s214_s7, %s199_s8, %s1552_s9, %s1552_s9, %s1551_s1  }
  0x24   : > { %s1213_s10 = sand.u32 (!%p1165_p8), 1, %s1060_s16  }
  0x25   : > { %s754_s13 = sshll.u32 (!%p1165_p8), %s1213_s10, 8  ;;  %s228_s21 = scalar_lea.sflag (!%p1165_p8), [#allocation3], %s1213_s10 }
  0x26   : > { %s1219_s11 = scalar_lea.vmem (!%p1165_p8), [#allocation2], %s754_s13 }
  0x27   : > { %1039 = dma.done.wait (%p1152_p4), %s228_s21, 4096  }
  0x28   : > { %1041 = vsyncadd (%p1152_p4), %s228_s21, 4294963200 }
  0x29   : > { %1043 = dma.done.wait (%p1142_p1), [#allocation6], 2048  }
  0x2a   : > { %1045 = vsyncadd (%p1142_p1), [#allocation6], 4294965248  ;;  %v316_v0 = vld [vmem:[#allocation5 + $0x78] sm:$0xff]  ;;  %v315_v1 = vld [vmem:[#allocation5 + $0x70] sm:$0xff]  ;;  %s1274_s25 = scalar_lea.vmem [#allocation7], %s754_s13  ;;  %s766_s30 = sshll.u32 %s1068_s18, 8 }
  0x2b   : > { %321 = vmatpush.msra.mxu0 %v316_v0  ;;  %767 = vmatpush.msra.mxu1 %v316_v0  ;;  %v314_v2 = vld [vmem:[#allocation5 + $0x68] sm:$0xff]  ;;  %v313_v3 = vld [vmem:[#allocation5 + $0x60] sm:$0xff]  ;;  %v312_v4 = vld [vmem:[#allocation5 + $0x58] sm:$0xff]  ;;  %s595_s9 = scalar_lea.hbm %s1536_s3, %s766_s30  ;;  %s596_s14 = sshll.u32 %s1274_s25, 4  ;;  %s597_s14 = int_to_ptr.vmem [resolvable:$true] %s596_s14 }
  0x2c   : > { %768 = vmatpush.msra.mxu2 %v316_v0  ;;  %769 = vmatpush.msra.mxu3 %v316_v0  ;;  %v311_v5 = vld [vmem:[#allocation5 + $0x50] sm:$0xff]  ;;  %v310_v6 = vld [vmem:[#allocation5 + $0x48] sm:$0xff]  ;;  %v309_v7 = vld [vmem:[#allocation5 + $0x40] sm:$0xff]  ;;  %s598_s27 = sshll.u32 %s595_s9, 4  ;;  %s576_s28 = scalar_lea.sflag [#allocation4], %s1213_s10  ;;  %s599_s27 = int_to_ptr.hbm [resolvable:$true] %s598_s27 }
  0x2d   : > { %322 = vmatpush.msra.mxu0 %v315_v1  ;;  %770 = vmatpush.msra.mxu1 %v315_v1  ;;  %v308_v8 = vld [vmem:[#allocation5 + $0x38] sm:$0xff]  ;;  %v307_v9 = vld [vmem:[#allocation5 + $0x30] sm:$0xff]  ;;  %v306_v10 = vld [vmem:[#allocation5 + $0x28] sm:$0xff]  ;;  %s972_s29 = sshra.s32 %s599_s27, 4  ;;  %s978_s13 = scalar_lea.hbm %s1536_s3, 512  ;;  %s973_s29 = int_to_ptr.hbm [resolvable:$true] %s972_s29 }
  0x2e   : > { %771 = vmatpush.msra.mxu2 %v315_v1  ;;  %772 = vmatpush.msra.mxu3 %v315_v1  ;;  %v305_v11 = vld [vmem:[#allocation5 + $0x20] sm:$0xff]  ;;  %v304_v12 = vld [vmem:[#allocation5 + $0x18] sm:$0xff]  ;;  %v303_v13 = vld [vmem:[#allocation5 + $0x10] sm:$0xff]  ;;  %s974_s5 = scalar_lea.hbm %s973_s29, 256  ;;  %p979_p10 = scmp.lt.s32.totalorder %s973_s29, %s1536_s3 }
  0x2f   : > { %323 = vmatpush.msra.mxu0 %v314_v2  ;;  %773 = vmatpush.msra.mxu1 %v314_v2  ;;  %v302_v14 = vld [vmem:[#allocation5 + $0x8] sm:$0xff]  ;;  %v301_v15 = vld [vmem:[#allocation5] sm:$0xff]  ;;  %v271_v23 = vld [vmem:[%s1219_s11 + $0x10] sm:$0xff]  ;;  %p975_p1 = scmp.ne.s32.totalorder %s973_s29, %s974_s5  ;;  %p980_p12 = scmp.lt.s32.totalorder %s978_s13, %s974_s5 }
  0x30   : > { %774 = vmatpush.msra.mxu2 %v314_v2  ;;  %775 = vmatpush.msra.mxu3 %v314_v2  ;;  %v269_v16 = vld [vmem:[%s1219_s11] sm:$0xff]  ;;  %v270_v19 = vld [vmem:[%s1219_s11 + $0x8] sm:$0xff]  ;;  %v279_v24 = vld [vmem:[%s1219_s11 + $0x50] sm:$0xff] }
  0x31   : > { %324 = vmatpush.msra.mxu0 %v313_v3  ;;  %776 = vmatpush.msra.mxu1 %v313_v3  ;;  %v277_v17 = vld [vmem:[%s1219_s11 + $0x40] sm:$0xff]  ;;  %v278_v20 = vld [vmem:[%s1219_s11 + $0x48] sm:$0xff]  ;;  %v287_v25 = vld [vmem:[%s1219_s11 + $0x90] sm:$0xff]  ;;  %p976_p4 = pnand %p975_p1, %p1190_p5  ;;  %p981_p13 = por %p980_p12, %p979_p10 }
  0x32   : > { %777 = vmatpush.msra.mxu2 %v313_v3  ;;  %778 = vmatpush.msra.mxu3 %v313_v3  ;;  %v285_v18 = vld [vmem:[%s1219_s11 + $0x80] sm:$0xff]  ;;  %v286_v21 = vld [vmem:[%s1219_s11 + $0x88] sm:$0xff]  ;;  %v272_v27 = vld [vmem:[%s1219_s11 + $0x18] sm:$0xff] }
  0x33   : > { %325 = vmatpush.msra.mxu0 %v312_v4  ;;  %779 = vmatpush.msra.mxu1 %v312_v4  ;;  %v293_v22 = vld [vmem:[%s1219_s11 + $0xc0] sm:$0xff]  ;;  %v294_v26 = vld [vmem:[%s1219_s11 + $0xc8] sm:$0xff]  ;;  %v280_v28 = vld [vmem:[%s1219_s11 + $0x58] sm:$0xff]  ;;  %p977_p8 = pneg %p976_p4 }
  0x34   : > { %780 = vmatpush.msra.mxu2 %v312_v4  ;;  %781 = vmatpush.msra.mxu3 %v312_v4  ;;  %v288_v29 = vld [vmem:[%s1219_s11 + $0x98] sm:$0xff]  ;;  %v295_v30 = vld [vmem:[%s1219_s11 + $0xd0] sm:$0xff]  ;;  %v273_v31 = vld [vmem:[%s1219_s11 + $0x20] sm:$0xff] }
  0x35   : > { %326 = vmatpush.msra.mxu0 %v311_v5  ;;  %782 = vmatpush.msra.mxu1 %v311_v5  ;;  %v281_v32 = vld [vmem:[%s1219_s11 + $0x60] sm:$0xff]  ;;  %v296_v33 = vld [vmem:[%s1219_s11 + $0xd8] sm:$0xff]  ;;  %v274_v35 = vld [vmem:[%s1219_s11 + $0x28] sm:$0xff]  ;;  %p982_p0 = pnand %p981_p13, %p977_p8 }
  0x36   : > { %783 = vmatpush.msra.mxu2 %v311_v5  ;;  %784 = vmatpush.msra.mxu3 %v311_v5  ;;  %v289_v34 = vld [vmem:[%s1219_s11 + $0xa0] sm:$0xff]  ;;  %v282_v36 = vld [vmem:[%s1219_s11 + $0x68] sm:$0xff]  ;;  %v275_v39 = vld [vmem:[%s1219_s11 + $0x30] sm:$0xff] }
  0x37   : > { %327 = vmatpush.msra.mxu0 %v310_v6  ;;  %785 = vmatpush.msra.mxu1 %v310_v6  ;;  %v297_v37 = vld [vmem:[%s1219_s11 + $0xe0] sm:$0xff]  ;;  %v290_v38 = vld [vmem:[%s1219_s11 + $0xa8] sm:$0xff]  ;;  %v283_v40 = vld [vmem:[%s1219_s11 + $0x70] sm:$0xff] }
  0x38   : > { %786 = vmatpush.msra.mxu2 %v310_v6  ;;  %787 = vmatpush.msra.mxu3 %v310_v6  ;;  %v298_v41 = vld [vmem:[%s1219_s11 + $0xe8] sm:$0xff]  ;;  %v291_v42 = vld [vmem:[%s1219_s11 + $0xb0] sm:$0xff]  ;;  %v276_v43 = vld [vmem:[%s1219_s11 + $0x38] sm:$0xff] }
  0x39   : > { %328 = vmatpush.msra.mxu0 %v309_v7  ;;  %788 = vmatpush.msra.mxu1 %v309_v7  ;;  %v284_v44 = vld [vmem:[%s1219_s11 + $0x78] sm:$0xff]  ;;  %v299_v45 = vld [vmem:[%s1219_s11 + $0xf0] sm:$0xff]  ;;  %v1264_v48 = vld [vmem:[%s1535_s2] ss:$0 sm:$0xff] }
  0x3a   : > { %789 = vmatpush.msra.mxu2 %v309_v7  ;;  %790 = vmatpush.msra.mxu3 %v309_v7  ;;  %v292_v46 = vld [vmem:[%s1219_s11 + $0xb8] sm:$0xff] }
  0x3b   : > { %329 = vmatpush.msra.mxu0 %v308_v8  ;;  %791 = vmatpush.msra.mxu1 %v308_v8  ;;  %v300_v47 = vld [vmem:[%s1219_s11 + $0xf8] sm:$0xff] }
  0x3c   : > { %792 = vmatpush.msra.mxu2 %v308_v8  ;;  %793 = vmatpush.msra.mxu3 %v308_v8 }
  0x3d   : > { %330 = vmatpush.msra.mxu0 %v307_v9  ;;  %794 = vmatpush.msra.mxu1 %v307_v9 }
  0x3e   : > { %795 = vmatpush.msra.mxu2 %v307_v9  ;;  %796 = vmatpush.msra.mxu3 %v307_v9 }
  0x3f   : > { %331 = vmatpush.msra.mxu0 %v306_v10  ;;  %797 = vmatpush.msra.mxu1 %v306_v10 }
  0x40   : > { %798 = vmatpush.msra.mxu2 %v306_v10  ;;  %799 = vmatpush.msra.mxu3 %v306_v10 }
  0x41   : > { %332 = vmatpush.msra.mxu0 %v305_v11  ;;  %800 = vmatpush.msra.mxu1 %v305_v11 }
  0x42   : > { %801 = vmatpush.msra.mxu2 %v305_v11  ;;  %802 = vmatpush.msra.mxu3 %v305_v11 }
  0x43   : > { %333 = vmatpush.msra.mxu0 %v304_v12  ;;  %803 = vmatpush.msra.mxu1 %v304_v12 }
  0x44   : > { %804 = vmatpush.msra.mxu2 %v304_v12  ;;  %805 = vmatpush.msra.mxu3 %v304_v12 }
  0x45   : > { %334 = vmatpush.msra.mxu0 %v303_v13  ;;  %806 = vmatpush.msra.mxu1 %v303_v13 }
  0x46   : > { %807 = vmatpush.msra.mxu2 %v303_v13  ;;  %808 = vmatpush.msra.mxu3 %v303_v13 }
  0x47   : > { %335 = vmatpush.msra.mxu0 %v302_v14  ;;  %809 = vmatpush.msra.mxu1 %v302_v14 }
  0x48   : > { %810 = vmatpush.msra.mxu2 %v302_v14  ;;  %811 = vmatpush.msra.mxu3 %v302_v14 }
  0x49   : > { %336 = vmatpush.msra.mxu0 %v301_v15  ;;  %812 = vmatpush.msra.mxu1 %v301_v15 }
  0x4a   : > { %337 = vmatmul.f32.vlgmr.msra.gmra.mxu0 %v269_v16  ;;  %361 = vmatmul.f32.vlgmr.msra.gmra.mxu1 %v277_v17 }
  0x4b   : > { %813 = vmatpush.msra.mxu2 %v301_v15  ;;  %814 = vmatpush.msra.mxu3 %v301_v15 }
  0x4c   : > { %385 = vmatmul.f32.vlgmr.msra.gmra.mxu2 %v285_v18  ;;  %409 = vmatmul.f32.vlgmr.msra.gmra.mxu3 %v293_v22 }
  0x52   : > { %340 = vmatmul.f32.gmra.mxu0 %v270_v19  ;;  %364 = vmatmul.f32.gmra.mxu1 %v278_v20 }
  0x54   : > { %388 = vmatmul.f32.gmra.mxu2 %v286_v21  ;;  %412 = vmatmul.f32.gmra.mxu3 %v294_v26 }
  0x5a   : > { %343 = vmatmul.f32.gmra.mxu0 %v271_v23  ;;  %367 = vmatmul.f32.gmra.mxu1 %v279_v24 }
  0x5c   : > { %391 = vmatmul.f32.gmra.mxu2 %v287_v25  ;;  %415 = vmatmul.f32.gmra.mxu3 %v295_v30 }
  0x62   : > { %346 = vmatmul.f32.gmra.mxu0 %v272_v27  ;;  %370 = vmatmul.f32.gmra.mxu1 %v280_v28 }
  0x64   : > { %394 = vmatmul.f32.gmra.mxu2 %v288_v29  ;;  %418 = vmatmul.f32.gmra.mxu3 %v296_v33 }
  0x6a   : > { %349 = vmatmul.f32.gmra.mxu0 %v273_v31  ;;  %373 = vmatmul.f32.gmra.mxu1 %v281_v32 }
  0x6c   : > { %397 = vmatmul.f32.gmra.mxu2 %v289_v34  ;;  %421 = vmatmul.f32.gmra.mxu3 %v297_v37 }
  0x72   : > { %352 = vmatmul.f32.gmra.mxu0 %v274_v35  ;;  %376 = vmatmul.f32.gmra.mxu1 %v282_v36 }
  0x74   : > { %400 = vmatmul.f32.gmra.mxu2 %v290_v38  ;;  %424 = vmatmul.f32.gmra.mxu3 %v298_v41 }
  0x7a   : > { %355 = vmatmul.f32.gmra.mxu0 %v275_v39  ;;  %379 = vmatmul.f32.gmra.mxu1 %v283_v40 }
  0x7c   : > { %403 = vmatmul.f32.gmra.mxu2 %v291_v42  ;;  %427 = vmatmul.f32.gmra.mxu3 %v299_v45 }
  0x82   : > { %358 = vmatmul.f32.gmra.mxu0 %v276_v43  ;;  %382 = vmatmul.f32.gmra.mxu1 %v284_v44 }
  0x84   : > { %406 = vmatmul.f32.gmra.mxu2 %v292_v46  ;;  %430 = vmatmul.f32.gmra.mxu3 %v300_v47 }
  0xc7   : > { %v338_v49 = vpop.f32.mrf.mxu0  ;;  %v362_v50 = vpop.f32.mrf.mxu1 }
  0xc8   : > { %v1267_v51 = vadd.f32 %v1264_v48, %v338_v49  ;;  %v1270_v52 = vadd.f32 %v1264_v48, %v362_v50 }
  0xca   : > { %434 = vst [vmem:[%s1274_s25] sm:$0xff] %v1267_v51  ;;  %v503_v28 = vmul.f32 %v1267_v51, %v1267_v51 }
  0xcb   : > { %442 = vst [vmem:[%s1274_s25 + $0x40] sm:$0xff] %v1270_v52 }
  0xcf   : > { %v341_v53 = vpop.f32.mrf.mxu0  ;;  %v365_v54 = vpop.f32.mrf.mxu1 }
  0xd0   : > { %v342_v55 = vadd.f32 %v1264_v48, %v341_v53  ;;  %v1282_v56 = vadd.f32 %v1264_v48, %v365_v54  ;;  %v386_v57 = vpop.f32.mrf.mxu2  ;;  %v410_v0 = vpop.f32.mrf.mxu3 }
  0xd1   : > { %v1285_v58 = vadd.f32 %v1264_v48, %v386_v57  ;;  %v1300_v2 = vadd.f32 %v1264_v48, %v410_v0 }
  0xd2   : > { %435 = vst [vmem:[%s1274_s25 + $0x8] sm:$0xff] %v342_v55  ;;  %v504_v27 = vmul.f32 %v342_v55, %v342_v55  ;;  %v466_v29 = vadd.f32 %v342_v55, %v1267_v51 }
  0xd3   : > { %443 = vst [vmem:[%s1274_s25 + $0x48] sm:$0xff] %v1282_v56 }
  0xd4   : > { %450 = vst [vmem:[%s1274_s25 + $0x80] sm:$0xff] %v1285_v58  ;;  %v535_v31 = vadd.f32 %v504_v27, %v503_v28 }
  0xd5   : > { %458 = vst [vmem:[%s1274_s25 + $0xc0] sm:$0xff] %v1300_v2 }
  0xd7   : > { %v344_v59 = vpop.f32.mrf.mxu0  ;;  %v368_v60 = vpop.f32.mrf.mxu1 }
  0xd8   : > { %v345_v61 = vadd.f32 %v1264_v48, %v344_v59  ;;  %v1294_v62 = vadd.f32 %v1264_v48, %v368_v60  ;;  %v389_v63 = vpop.f32.mrf.mxu2  ;;  %v413_v8 = vpop.f32.mrf.mxu3 }
  0xd9   : > { %v1297_v1 = vadd.f32 %v1264_v48, %v389_v63  ;;  %v1317_v10 = vadd.f32 %v1264_v48, %v413_v8  ;;  %v511_v8 = vmul.f32 %v1270_v52, %v1270_v52 }
  0xda   : > { %436 = vst [vmem:[%s1274_s25 + $0x10] sm:$0xff] %v345_v61  ;;  %v505_v30 = vmul.f32 %v345_v61, %v345_v61  ;;  %v467_v34 = vadd.f32 %v466_v29, %v345_v61 }
  0xdb   : > { %444 = vst [vmem:[%s1274_s25 + $0x50] sm:$0xff] %v1294_v62 }
  0xdc   : > { %451 = vst [vmem:[%s1274_s25 + $0x88] sm:$0xff] %v1297_v1  ;;  %v536_v42 = vadd.f32 %v535_v31, %v505_v30 }
  0xdd   : > { %459 = vst [vmem:[%s1274_s25 + $0xc8] sm:$0xff] %v1317_v10 }
  0xdf   : > { %v347_v3 = vpop.f32.mrf.mxu0  ;;  %v371_v4 = vpop.f32.mrf.mxu1 }
  0xe0   : > { %v348_v5 = vadd.f32 %v1264_v48, %v347_v3  ;;  %v1311_v6 = vadd.f32 %v1264_v48, %v371_v4  ;;  %v392_v7 = vpop.f32.mrf.mxu2  ;;  %v416_v16 = vpop.f32.mrf.mxu3 }
  0xe1   : > { %v1314_v9 = vadd.f32 %v1264_v48, %v392_v7  ;;  %v1334_v18 = vadd.f32 %v1264_v48, %v416_v16 }
  0xe2   : > { %437 = vst [vmem:[%s1274_s25 + $0x18] sm:$0xff] %v348_v5  ;;  %v506_v35 = vmul.f32 %v348_v5, %v348_v5  ;;  %v468_v43 = vadd.f32 %v467_v34, %v348_v5 }
  0xe3   : > { %445 = vst [vmem:[%s1274_s25 + $0x58] sm:$0xff] %v1311_v6 }
  0xe4   : > { %452 = vst [vmem:[%s1274_s25 + $0x90] sm:$0xff] %v1314_v9  ;;  %v537_v45 = vadd.f32 %v536_v42, %v506_v35 }
  0xe5   : > { %460 = vst [vmem:[%s1274_s25 + $0xd0] sm:$0xff] %v1334_v18 }
  0xe7   : > { %v350_v11 = vpop.f32.mrf.mxu0  ;;  %v374_v12 = vpop.f32.mrf.mxu1 }
  0xe8   : > { %v351_v13 = vadd.f32 %v1264_v48, %v350_v11  ;;  %v1328_v14 = vadd.f32 %v1264_v48, %v374_v12  ;;  %v395_v15 = vpop.f32.mrf.mxu2  ;;  %v419_v24 = vpop.f32.mrf.mxu3 }
  0xe9   : > { %v1331_v17 = vadd.f32 %v1264_v48, %v395_v15  ;;  %v1351_v26 = vadd.f32 %v1264_v48, %v419_v24 }
  0xea   : > { %438 = vst [vmem:[%s1274_s25 + $0x20] sm:$0xff] %v351_v13  ;;  %v507_v44 = vmul.f32 %v351_v13, %v351_v13  ;;  %v469_v46 = vadd.f32 %v468_v43, %v351_v13  ;;  %v512_v13 = vmul.f32 %v1282_v56, %v1282_v56 }
  0xeb   : > { %446 = vst [vmem:[%s1274_s25 + $0x60] sm:$0xff] %v1328_v14 }
  0xec   : > { %453 = vst [vmem:[%s1274_s25 + $0x98] sm:$0xff] %v1331_v17  ;;  %v538_v49 = vadd.f32 %v537_v45, %v507_v44 }
  0xed   : > { %461 = vst [vmem:[%s1274_s25 + $0xd8] sm:$0xff] %v1351_v26 }
  0xef   : > { %v353_v19 = vpop.f32.mrf.mxu0  ;;  %v377_v20 = vpop.f32.mrf.mxu1 }
  0xf0   : > { %v354_v21 = vadd.f32 %v1264_v48, %v353_v19  ;;  %v1345_v22 = vadd.f32 %v1264_v48, %v377_v20  ;;  %v398_v23 = vpop.f32.mrf.mxu2  ;;  %v422_v39 = vpop.f32.mrf.mxu3  ;;  %v513_v19 = vmul.f32 %v1294_v62, %v1294_v62 }
  0xf1   : > { %v1348_v25 = vadd.f32 %v1264_v48, %v398_v23  ;;  %v1371_v41 = vadd.f32 %v1264_v48, %v422_v39 }
  0xf2   : > { %439 = vst [vmem:[%s1274_s25 + $0x28] sm:$0xff] %v354_v21  ;;  %v508_v47 = vmul.f32 %v354_v21, %v354_v21  ;;  %v470_v50 = vadd.f32 %v469_v46, %v354_v21 }
  0xf3   : > { %447 = vst [vmem:[%s1274_s25 + $0x68] sm:$0xff] %v1345_v22 }
  0xf4   : > { %454 = vst [vmem:[%s1274_s25 + $0xa0] sm:$0xff] %v1348_v25  ;;  %v539_v55 = vadd.f32 %v538_v49, %v508_v47 }
  0xf5   : > { %462 = vst [vmem:[%s1274_s25 + $0xe0] sm:$0xff] %v1371_v41 }
  0xf7   : > { %v356_v32 = vpop.f32.mrf.mxu0  ;;  %v380_v33 = vpop.f32.mrf.mxu1 }
  0xf8   : > { %v357_v36 = vadd.f32 %v1264_v48, %v356_v32  ;;  %v1365_v37 = vadd.f32 %v1264_v48, %v380_v33  ;;  %v401_v38 = vpop.f32.mrf.mxu2  ;;  %v425_v63 = vpop.f32.mrf.mxu3  ;;  %v516_v32 = vmul.f32 %v1345_v22, %v1345_v22 }
  0xf9   : > { %v1368_v40 = vadd.f32 %v1264_v48, %v401_v38  ;;  %v1386_v3 = vadd.f32 %v1264_v48, %v425_v63 }
  0xfa   : > { %440 = vst [vmem:[%s1274_s25 + $0x30] sm:$0xff] %v357_v36  ;;  %v509_v51 = vmul.f32 %v357_v36, %v357_v36  ;;  %v471_v57 = vadd.f32 %v470_v50, %v357_v36  ;;  %v517_v36 = vmul.f32 %v1365_v37, %v1365_v37 }
  0xfb   : > { %448 = vst [vmem:[%s1274_s25 + $0x70] sm:$0xff] %v1365_v37 }
  0xfc   : > { %455 = vst [vmem:[%s1274_s25 + $0xa8] sm:$0xff] %v1368_v40  ;;  %v540_v4 = vadd.f32 %v539_v55, %v509_v51 }
  0xfd   : > { %463 = vst [vmem:[%s1274_s25 + $0xe8] sm:$0xff] %v1386_v3 }
  0xff   : > { %v359_v53 = vpop.f32.mrf.mxu0  ;;  %v383_v54 = vpop.f32.mrf.mxu1 }
 0x100   : > { %v360_v59 = vadd.f32 %v1264_v48, %v359_v53  ;;  %v384_v60 = vadd.f32 %v1264_v48, %v383_v54  ;;  %v404_v61 = vpop.f32.mrf.mxu2  ;;  %v428_v23 = vpop.f32.mrf.mxu3 }
 0x101   : > { %v1383_v0 = vadd.f32 %v1264_v48, %v404_v61  ;;  %v1408_v27 = vadd.f32 %v1264_v48, %v428_v23 }
 0x102   : > { %441 = vst [vmem:[%s1274_s25 + $0x38] sm:$0xff] %v360_v59  ;;  %v472_v5 = vadd.f32 %v471_v57, %v360_v59  ;;  %v510_v7 = vmul.f32 %v360_v59, %v360_v59 }
 0x103   : > { %449 = vst [vmem:[%s1274_s25 + $0x78] sm:$0xff] %v384_v60 }
 0x104   : > { %v473_v11 = vadd.f32 %v472_v5, %v1270_v52  ;;  %v541_v12 = vadd.f32 %v540_v4, %v510_v7  ;;  %456 = vst [vmem:[%s1274_s25 + $0xb0] sm:$0xff] %v1383_v0 }
 0x105   : > { %464 = vst [vmem:[%s1274_s25 + $0xf0] sm:$0xff] %v1408_v27 }
 0x106   : > { %v474_v15 = vadd.f32 %v473_v11, %v1282_v56  ;;  %v542_v16 = vadd.f32 %v541_v12, %v511_v8  ;;  %v514_v56 = vmul.f32 %v1311_v6, %v1311_v6 }
 0x108   : > { %v543_v20 = vadd.f32 %v542_v16, %v512_v13  ;;  %v475_v52 = vadd.f32 %v474_v15, %v1294_v62  ;;  %v407_v21 = vpop.f32.mrf.mxu2  ;;  %v515_v62 = vmul.f32 %v1328_v14, %v1328_v14  ;;  %v431_v38 = vpop.f32.mrf.mxu3 }
 0x109   : > { %v1405_v24 = vadd.f32 %v1264_v48, %v407_v21  ;;  %v1431_v39 = vadd.f32 %v1264_v48, %v431_v38 }
 0x10a   : > { %v476_v28 = vadd.f32 %v475_v52, %v1311_v6  ;;  %v544_v29 = vadd.f32 %v543_v20, %v513_v19 }
 0x10b   : > { %457 = vst [vmem:[%s1274_s25 + $0xb8] sm:$0xff] %v1405_v24 }
 0x10c   : > { %v477_v30 = vadd.f32 %v476_v28, %v1328_v14  ;;  %v545_v31 = vadd.f32 %v544_v29, %v514_v56  ;;  %v518_v14 = vmul.f32 %v384_v60, %v384_v60  ;;  %465 = vst [vmem:[%s1274_s25 + $0xf8] sm:$0xff] %v1431_v39 }
 0x10e   : > { %v478_v6 = vadd.f32 %v477_v30, %v1345_v22  ;;  %v546_v33 = vadd.f32 %v545_v31, %v515_v62  ;;  %v519_v22 = vmul.f32 %v1285_v58, %v1285_v58 }
 0x110   : > { %v547_v34 = vadd.f32 %v546_v33, %v516_v32  ;;  %v479_v35 = vadd.f32 %v478_v6, %v1365_v37 }
 0x112   : > { %v548_v42 = vadd.f32 %v547_v34, %v517_v36  ;;  %v480_v43 = vadd.f32 %v479_v35, %v384_v60 }
 0x114   : > { %v481_v44 = vadd.f32 %v480_v43, %v1285_v58  ;;  %v549_v45 = vadd.f32 %v548_v42, %v518_v14 }
 0x115   : > { %985 = shalt.err (!%p982_p0)
}
 0x116   : > { %s1081_s1 = smov 128   ;;  %s1082_s23 = smov 8   ;;  %v520_v48 = vmul.f32 %v1297_v1, %v1297_v1  ;;  %v482_v58 = vadd.f32 %v481_v44, %v1297_v1  ;;  %v550_v37 = vadd.f32 %v549_v45, %v519_v22  ;;  %v521_v46 = vmul.f32 %v1314_v9, %v1314_v9 }
 0x117   : > { %821 = dma.vmem_to_hbm [thread:$0]  (%p1190_p5), %s597_s14, 4096, %s599_s27, %s576_s28, %s1081_s1, %s1081_s1, %s1082_s23   ;;  %v522_v50 = vmul.f32 %v1331_v17, %v1331_v17  ;;  %v523_v54 = vmul.f32 %v1348_v25, %v1348_v25  ;;  %v524_v59 = vmul.f32 %v1368_v40, %v1368_v40  ;;  %v525_v63 = vmul.f32 %v1383_v0, %v1383_v0 }
 0x118   : > { %v551_v47 = vadd.f32 %v550_v37, %v520_v48  ;;  %v483_v49 = vadd.f32 %v482_v58, %v1314_v9  ;;  %v530_v16 = vmul.f32 %v1351_v26, %v1351_v26  ;;  %v532_v23 = vmul.f32 %v1386_v3, %v1386_v3  ;;  %s757_s25 = sshll.u32 %s1213_s10, 1  ;;  %s762_s30 = sshll.u32 %s1068_s18, 1 }
 0x119   : > { %v534_v28 = vmul.f32 %v1431_v39, %v1431_v39  ;;  %s612_s9 = scalar_lea.hbm %s1537_s4, %s762_s30  ;;  %s266_s14 = scalar_lea.vmem [#allocation8], %s757_s25  ;;  %vm572_vm0 = vcmask 1040384  }
 0x11a   : > { %v484_v51 = vadd.f32 %v483_v49, %v1331_v17  ;;  %v552_v53 = vadd.f32 %v551_v47, %v521_v46  ;;  %v526_v17 = vmul.f32 %v1405_v24, %v1405_v24  ;;  %s614_s27 = sshll.u32 %s266_s14, 4  ;;  %s616_s28 = sshll.u32 %s612_s9, 4  ;;  %s615_s27 = int_to_ptr.vmem [resolvable:$true] %s614_s27  ;;  %s617_s28 = int_to_ptr.hbm [resolvable:$true] %s616_s28 }
 0x11b   : > { %s581_s18 = scalar_lea.sflag [#allocation9], %s1213_s10  ;;  %s1000_s29 = sshra.s32 %s617_s28, 4  ;;  %s1001_s29 = int_to_ptr.hbm [resolvable:$true] %s1000_s29 }
 0x11c   : > { %v485_v55 = vadd.f32 %v484_v51, %v1348_v25  ;;  %v553_v57 = vadd.f32 %v552_v53, %v522_v50  ;;  %v527_v25 = vmul.f32 %v1300_v2, %v1300_v2  ;;  %s1002_s5 = scalar_lea.hbm %s1001_s29, 2  ;;  %s1006_s13 = scalar_lea.hbm %s1537_s4, 4 }
 0x11d   : > { %p1003_p3 = scmp.ne.s32.totalorder %s1001_s29, %s1002_s5  ;;  %p1007_p2 = scmp.lt.s32.totalorder %s1001_s29, %s1537_s4 }
 0x11e   : > { %v486_v1 = vadd.f32 %v485_v55, %v1368_v40  ;;  %v554_v60 = vadd.f32 %v553_v57, %v523_v54  ;;  %v528_v40 = vmul.f32 %v1317_v10, %v1317_v10  ;;  %p1008_p1 = scmp.lt.s32.totalorder %s1006_s13, %s1002_s5 }
 0x11f   : > { %p1004_p7 = pnand %p1003_p3, %p1190_p5 }
 0x120   : > { %v555_v61 = vadd.f32 %v554_v60, %v524_v59  ;;  %v487_v9 = vadd.f32 %v486_v1, %v1383_v0  ;;  %v529_v0 = vmul.f32 %v1334_v18, %v1334_v18  ;;  %p1009_p4 = por %p1008_p1, %p1007_p2 }
 0x121   : > { %p1005_p9 = pneg %p1004_p7 }
 0x122   : > { %v556_v4 = vadd.f32 %v555_v61, %v525_v63  ;;  %v488_v5 = vadd.f32 %v487_v9, %v1405_v24 }
 0x123   : > { %p1010_p8 = pnand %p1009_p4, %p1005_p9 }
 0x124   : > { %v489_v7 = vadd.f32 %v488_v5, %v1300_v2  ;;  %v557_v8 = vadd.f32 %v556_v4, %v526_v17  ;;  %v531_v2 = vmul.f32 %v1371_v41, %v1371_v41 }
 0x126   : > { %v490_v11 = vadd.f32 %v489_v7, %v1317_v10  ;;  %v558_v12 = vadd.f32 %v557_v8, %v527_v25 }
 0x128   : > { %v559_v13 = vadd.f32 %v558_v12, %v528_v40  ;;  %v491_v15 = vadd.f32 %v490_v11, %v1334_v18 }
 0x12a   : > { %v492_v19 = vadd.f32 %v491_v15, %v1351_v26  ;;  %v560_v20 = vadd.f32 %v559_v13, %v529_v0  ;;  %v533_v26 = vmul.f32 %v1408_v27, %v1408_v27 }
 0x12c   : > { %v493_v52 = vadd.f32 %v492_v19, %v1371_v41  ;;  %v561_v21 = vadd.f32 %v560_v20, %v530_v16 }
 0x12e   : > { %v494_v10 = vadd.f32 %v493_v52, %v1386_v3  ;;  %v562_v18 = vadd.f32 %v561_v21, %v531_v2 }
 0x130   : > { %v563_v24 = vadd.f32 %v562_v18, %v532_v23  ;;  %v495_v56 = vadd.f32 %v494_v10, %v1408_v27 }
 0x132   : > { %v564_v29 = vadd.f32 %v563_v24, %v533_v26  ;;  %v496_v41 = vadd.f32 %v495_v56, %v1431_v39 }
 0x134   : > { %v497_v62 = vrot.slane %v496_v41, 4  ;;  %v565_v30 = vadd.f32 %v564_v29, %v534_v28 }
 0x136   : > { %v498_v31 = vadd.f32 %v497_v62, %v496_v41  ;;  %v566_v6 = vrot.slane %v565_v30, 4 }
 0x138   : > { %v499_v32 = vrot.slane %v498_v31, 2  ;;  %v567_v33 = vadd.f32 %v566_v6, %v565_v30 }
 0x13a   : > { %v500_v3 = vadd.f32 %v499_v32, %v498_v31  ;;  %v568_v34 = vrot.slane %v567_v33, 2 }
 0x13c   : > { %v501_v27 = vrot.slane %v500_v3, 1  ;;  %v569_v35 = vadd.f32 %v568_v34, %v567_v33 }
 0x13e   : > { %v570_v36 = vrot.slane %v569_v35, 1  ;;  %v502_v14 = vadd.f32 %v501_v27, %v500_v3 }
 0x140   : > { %v571_v38 = vadd.f32 %v570_v36, %v569_v35 }
 0x142   : > { %v573_v39 = vsel %vm572_vm0, %v502_v14, %v571_v38 }
 0x143   : > { %574 = vst [vmem:[%s266_s14] sm:$0x3] %v573_v39 }
 0x144   : > { %1013 = shalt.err (!%p1010_p8)
}
 0x145   : > { %822 = dma.vmem_to_hbm [thread:$0]  (%p1190_p5), %s615_s27, 32, %s617_s28, %s581_s18  }
 0x146 PF: > { %s628_s10 = sand.u32 1, %s1056_s15   ;;  %p834_p10 = pnand %p749_p11, %p1157_p6 }
 0x147   : > { %s629_s1 = scalar_lea.sflag [#allocation4], %s628_s10 }
 0x148   : > { %p835_p12 = pneg %p834_p10 }
 0x14a   : > { %1047 = dma.done.wait (%p835_p12), %s629_s1, 4096  }
 0x14b   : > { %1049 = vsyncadd (%p835_p12), %s629_s1, 4294963200  ;;  %s639_s23 = scalar_lea.sflag [#allocation9], %s628_s10 }
 0x14c   : > { %1051 = dma.done.wait (%p835_p12), %s639_s23, 32  }
 0x14d   : > { %1053 = vsyncadd (%p835_p12), %s639_s23, 4294967264  ;;  %s25_s20 = sadd.s32 1, %s1076_s20   ;;  %s1553_s12 = sld [smem:[#allocation14_spill]] }
 0x14e   : > { %p22_p13 = scmp.ge.s32.totalorder %s25_s20, 4   ;;  %s1554_s15 = smov %s1060_s16 }
 0x14f   : > { %s1555_s16 = smov %s1064_s17  ;;  %s1556_s17 = smov %s1199_s22 }
 0x150   : > { %s1557_s18 = smov %s1072_s19  ;;  %24 = sbr.rel (!%p22_p13) target bundleno = 11 (0xb), region = 98 }
 0x153   : > { %s1558_s19 = smov %s1553_s12 }
 0x155   :  { %645 = vsyncpa [#allocation3], 1 }
 0x156   :  { %647 = vsyncpa [#allocation3 + $0x1], 1 }
 0x157   :  { %648 = vsyncpa [#allocation6], 1 }
 0x158   :  { %649 = vsyncpa [#allocation4], 1 }
 0x159   :  { %651 = vsyncpa [#allocation4 + $0x1], 1 }
 0x15a   :  { %652 = vsyncpa [#allocation9], 1 }
 0x15b   :  { %654 = vsyncpa [#allocation9 + $0x1], 1 }

</bundles_post_ra>
